<compile_context>
chip_gen: v7x
topology: tpu7x:2x2x1
jax: 0.10.0
libtpu: 0.0.40
codegen_flags: <defaults>
</compile_context>

<pallas_src>
import functools
import math

import numpy as np
import jax
import jax.numpy as jnp
from jax.experimental import pallas as pl
from jax.experimental.pallas import tpu as pltpu

_LANE = 128


def build_bloom_slopes(num_heads: int) -> jnp.ndarray:
    """Deterministic per-head ALiBi slopes, identical to the PyTorch __init__."""
    closest_power_of_2 = 2 ** math.floor(math.log2(num_heads))
    base = np.float32(2 ** (-(2 ** (-(math.log2(closest_power_of_2) - 3)))))
    powers = np.arange(1, 1 + closest_power_of_2, dtype=np.int32)
    slopes = np.power(base, powers.astype(np.float32))
    if closest_power_of_2 != num_heads:
        extra_base = np.float32(
            2 ** (-(2 ** (-(math.log2(2 * closest_power_of_2) - 3))))
        )
        num_remaining_heads = min(closest_power_of_2, num_heads - closest_power_of_2)
        extra_powers = np.arange(1, 1 + 2 * num_remaining_heads, 2, dtype=np.int32)
        slopes = np.concatenate(
            [slopes, np.power(extra_base, extra_powers.astype(np.float32))], axis=0
        )
    return jnp.asarray(slopes, dtype=jnp.float32).reshape(num_heads, 1)


# --------------------------------------------------------------------------- #
# Kernel 1: head-independent position ids, computed once.                      #
# --------------------------------------------------------------------------- #
def _pos_kernel(n_chunks: int, mask_ref, pos_ref):
    """pos = (inclusive_cumsum(mask, -1) - 1) * mask over a (B, S_pad) block.

    mask_ref / pos_ref: (B, S_pad) f32, S_pad a multiple of 128.
    The per-chunk cumsum is a (B,128) x (128,128) MXU matmul against a fixed
    upper-triangular constant; the running prefix ("carry") is the last column
    of the previous chunk's cumsum.
    """
    batch = mask_ref.shape[0]

    row = jax.lax.broadcasted_iota(jnp.int32, (_LANE, _LANE), 0)
    col = jax.lax.broadcasted_iota(jnp.int32, (_LANE, _LANE), 1)
    tri = (row <= col).astype(jnp.float32)  # tri[k, j] = 1 iff k <= j

    def body(c, carry):
        lo = pl.multiple_of(c * _LANE, _LANE)
        chunk = mask_ref[:, pl.ds(lo, _LANE)]                         # (B, 128)
        csum = jnp.dot(chunk, tri, preferred_element_type=jnp.float32) + carry
        pos_ref[:, pl.ds(lo, _LANE)] = (csum - 1.0) * chunk
        return csum[:, _LANE - 1:_LANE]                               # new carry

    jax.lax.fori_loop(0, n_chunks, body, jnp.zeros((batch, 1), jnp.float32))


# --------------------------------------------------------------------------- #
# Kernel 2: per-(head-tile, seq-tile) broadcast-multiply-store.                 #
# --------------------------------------------------------------------------- #
def _bias_kernel(pos_ref, slopes_ref, out_ref):
    """out[b, h, s] = slopes[h] * pos[b, s] for one (B, TH, TS) output block."""
    bias = slopes_ref[...][None, :, :] * pos_ref[...][:, None, :]
    out_ref[...] = bias.astype(out_ref.dtype)


def _choose_tiles(batch, num_heads, seq_len,
                  max_block_bytes=4 * 1024 * 1024,
                  min_block_bytes=512 * 1024):
    """Pick (TH, TS) for the output block (B, TH, TS).

    Constraints: TH must be a multiple of 8 (sublane) or equal H; TS must be a
    multiple of 128 (lane) or equal S.  Target: block size in
    [min_block_bytes, max_block_bytes] with ~4+ grid steps when the total output
    is large enough, so the store DMA pipelines and v7x's 2 TCs both get work.
    """
    total_bytes = batch * num_heads * seq_len * 4
    target = min(max_block_bytes, max(min_block_bytes, total_bytes // 4))

    if num_heads % 8 == 0:
        th_cands = [d for d in range(8, num_heads + 1, 8) if num_heads % d == 0]
    else:
        th_cands = [num_heads]

    if seq_len <= _LANE:
        ts_cands = [seq_len]
    else:
        ts_cands = []
        t = _LANE
        while t <= seq_len:
            ts_cands.append(t)
            t *= 2
        if seq_len % _LANE == 0 and seq_len not in ts_cands:
            ts_cands.append(seq_len)

    best = None
    for th in th_cands:
        for ts in ts_cands:
            blk = batch * th * ts * 4
            fits = blk <= target
            # Prefer: fits under target; then largest block; then widest
            # (lane-dense) sequence tile.  If nothing fits, smallest block.
            key = (fits, blk if fits else -blk, ts)
            if best is None or key > best[0]:
                best = (key, th, ts)
    return best[1], best[2]


def bloom_alibi_embedding(attention_mask, slopes, *, block_h=None, block_s=None,
                          out_dtype=jnp.float32):
    """Pallas-backed BloomAlibiEmbedding.forward.

    attention_mask: (B, S) 0/1 mask (any numeric dtype).
    slopes:         (H, 1) float32 (see build_bloom_slopes).
    returns:        (B*H, 1, S) out_dtype (float32 by default, matching PyTorch).
    """
    B, S = attention_mask.shape
    H = slopes.shape[0]
    slopes = slopes.astype(jnp.float32).reshape(H, 1)
    mask = attention_mask.astype(jnp.float32)

    # ---- pass 1: position ids (head-independent), computed once -------------
    s_pad = ((S + _LANE - 1) // _LANE) * _LANE
    if s_pad != S:
        mask = jnp.pad(mask, ((0, 0), (0, s_pad - S)))
    # TODO(synk): for extreme B*S (> ~16 MiB of mask) tile the pos pass too.
    pos = pl.pallas_call(
        functools.partial(_pos_kernel, s_pad // _LANE),
        out_shape=jax.ShapeDtypeStruct((B, s_pad), jnp.float32),
        grid=(1,),
        in_specs=[pl.BlockSpec((B, s_pad), lambda i: (0, 0))],
        out_specs=pl.BlockSpec((B, s_pad), lambda i: (0, 0)),
    )(mask)
    if s_pad != S:
        pos = pos[:, :S]  # tiny (B, S) slice; padded tail is never consumed

    # ---- pass 2: broadcast-multiply-store over a (head, seq) grid -----------
    th, ts = _choose_tiles(B, H, S)
    if block_h is not None:
        assert H % block_h == 0 and (block_h % 8 == 0 or block_h == H), block_h
        th = block_h
    if block_s is not None:
        assert block_s <= S and (block_s % _LANE == 0 or block_s == S), block_s
        ts = block_s

    n_h = H // th
    n_s = (S + ts - 1) // ts

    out_bytes = B * H * S * jnp.dtype(out_dtype).itemsize
    cost = pl.CostEstimate(
        flops=B * H * S,
        transcendentals=0,
        bytes_accessed=out_bytes + B * S * 4 + H * 4,
    )

    out = pl.pallas_call(
        _bias_kernel,
        out_shape=jax.ShapeDtypeStruct((B, H, S), out_dtype),
        grid=(n_h, n_s),
        in_specs=[
            pl.BlockSpec((B, ts), lambda h, s: (0, s)),   # pos: varies with s only
            pl.BlockSpec((th, 1), lambda h, s: (h, 0)),   # slopes: varies with h only
        ],
        out_specs=pl.BlockSpec((B, th, ts), lambda h, s: (0, h, s)),
        compiler_params=pltpu.CompilerParams(
            # All blocks are independent -> pipeline freely, shard across the
            # two TensorCores on v7x.
            dimension_semantics=("parallel", "parallel"),
        ),
        cost_estimate=cost,
    )(pos, slopes)

    # Free reshape: (B, H, S) row-major == PyTorch's alibi.reshape(-1, 1, seq_length).
    return out.reshape(B * H, 1, S)


def _reference(attention_mask, slopes):
    """Plain-JAX reference matching the PyTorch forward semantics."""
    mask = attention_mask.astype(jnp.float32)
    S = mask.shape[-1]
    pos = (jnp.cumsum(mask, axis=-1) - 1.0) * mask
    alibi = slopes.astype(jnp.float32)[None, :, :] * pos[:, None, :]
    return alibi.reshape(-1, 1, S)


if __name__ == "__main__":
    num_heads = 12   # non-power-of-2: exercises the extra-slopes branch
    batch = 2
    seq = 16

    key = jax.random.PRNGKey(0)
    # Typical attention mask: ones with a random amount of right padding per row.
    lens = jax.random.randint(key, (batch,), minval=4, maxval=seq + 1)
    col_ids = jnp.arange(seq)[None, :]
    attention_mask = (col_ids < lens[:, None]).astype(jnp.float32)   # (B, S)

    slopes = build_bloom_slopes(num_heads)                           # (H, 1)

    out = bloom_alibi_embedding(attention_mask, slopes)
    out = jax.block_until_ready(out)

    ref = _reference(attention_mask, slopes)
    assert out.shape == (batch * num_heads, 1, seq), out.shape
    assert out.dtype == jnp.float32
    err = float(jnp.max(jnp.abs(out - ref)))
    assert err < 1e-5, f"max abs err {err}"

    print("KERNEL_OK")
</pallas_src>

<mosaic_0001>
module attributes {stable_mosaic.version = 11 : i64} {
  func.func @_pos_kernel(%arg0: i32, %arg1: memref<2x128xf32, #tpu.memory_space<vmem>>, %arg2: memref<2x128xf32, #tpu.memory_space<vmem>>) attributes {dimension_semantics = [#tpu.dimension_semantics<arbitrary>], iteration_bounds = array<i64: 1>, scalar_prefetch = 0 : i64, scratch_operands = 0 : i64, tpu.core_type = #tpu.core_type<tc>, window_params = [{pipeline_mode = #tpu.pipeline_mode<synchronous>, transform_indices = @transform_0, window_bounds = array<i64: 2, 128>}, {pipeline_mode = #tpu.pipeline_mode<synchronous>, transform_indices = @transform_1, window_bounds = array<i64: 2, 128>}]} {
    %0 = tpu.iota {dimensions = array<i32: 0>} : vector<128x128xi32>
    %1 = tpu.iota {dimensions = array<i32: 1>} : vector<128x128xi32>
    %2 = arith.cmpi sle, %0, %1 : vector<128x128xi32>
    %3 = arith.extui %2 : vector<128x128xi1> to vector<128x128xi32>
    %4 = arith.sitofp %3 : vector<128x128xi32> to vector<128x128xf32>
    %cst = arith.constant 0.000000e+00 : f32
    %5 = vector.broadcast %cst : f32 to vector<2x1xf32>
    %c0_i32 = arith.constant 0 : i32
    %c128_i32 = arith.constant 128 : i32
    %6 = arith.muli %c0_i32, %c128_i32 : i32
    %7 = tpu.assume_multiple %6, 128 : i32
    %c0 = arith.constant 0 : index
    %8 = arith.index_cast %7 : i32 to index
    %9 = vector.load %arg1[%c0, %8] : memref<2x128xf32, #tpu.memory_space<vmem>>, vector<2x128xf32>
    %cst_0 = arith.constant dense<0.000000e+00> : vector<2x128xf32>
    %10 = tpu.matmul %9, %4, %cst_0 {dimension_numbers = #tpu.dot_dimension_numbers<[1], [0], [0], [1], [0, 0, 1, 1], [], []>} : vector<2x128xf32>, vector<128x128xf32>, vector<2x128xf32> -> vector<2x128xf32>
    %11 = vector.broadcast %5 : vector<2x1xf32> to vector<2x128xf32>
    %12 = arith.addf %10, %11 : vector<2x128xf32>
    %cst_1 = arith.constant 1.000000e+00 : f32
    %13 = vector.broadcast %cst_1 : f32 to vector<2x128xf32>
    %14 = arith.subf %12, %13 : vector<2x128xf32>
    %15 = arith.mulf %14, %9 : vector<2x128xf32>
    %c0_2 = arith.constant 0 : index
    %16 = arith.index_cast %7 : i32 to index
    %17 = vector.load %arg2[%c0_2, %16] : memref<2x128xf32, #tpu.memory_space<vmem>>, vector<2x128xf32>
    tpu.vector_store %arg2[%c0_2, %16], %15 {strides = array<i32>} : memref<2x128xf32, #tpu.memory_space<vmem>>, vector<2x128xf32>,
    %18 = vector.extract_strided_slice %12 {offsets = [0, 127], sizes = [2, 1], strides = [1, 1]} : vector<2x128xf32> to vector<2x1xf32>
    %c1_i32 = arith.constant 1 : i32
    return
  }
  func.func @transform_0(%arg0: i32) -> (i32, i32) {
    %c0_i32 = arith.constant 0 : i32
    %c0_i32_0 = arith.constant 0 : i32
    %c0_i32_1 = arith.constant 0 : i32
    return %c0_i32, %c0_i32_0 : i32, i32
  }
  func.func @transform_1(%arg0: i32) -> (i32, i32) {
    %c0_i32 = arith.constant 0 : i32
    %c0_i32_0 = arith.constant 0 : i32
    %c0_i32_1 = arith.constant 0 : i32
    return %c0_i32, %c0_i32_0 : i32, i32
  }
}

</mosaic_0001>

<bundles_post_ra>
// kernel: tpu_custom_call.1
= control target key start
LH: loop header
LB: loop body
LE: loop exit
PB: predicated region body
PF: predicated region fallthrough
CT: control target
= control target key end

     0   :  { %6 = vsyncpa [#allocation3], 0  ;;  %s380_s0 = inlined_call_operand.hbm [shape: f32[2,128], index: 0, kind: input, shape index: {}]   ;;  %s381_s1 = inlined_call_operand.hbm [shape: f32[2,128], index: 1, kind: output, shape index: {}]  }
   0x1   :  { %7 = vsyncpa [#allocation4], 0  ;;  %s340_s6 = smov [#allocation2]   ;;  %s292_s10 = scalar_lea.hbm %s380_s0, 32 }
   0x2   :  { %s14_s7 = sshll.u32 %s340_s6, 4  ;;  %p293_p0 = scmp.ne.s32.totalorder %s380_s0, %s292_s10  ;;  %s15_s7 = int_to_ptr.vmem [resolvable:$true] %s14_s7 }
   0x3   :  { %p296_p1 = scmp.lt.u32.totalorder %s292_s10, %s380_s0 }
   0x5   :  { %p298_p2 = pnand %p296_p1, %p293_p0 }
   0x7   :  { %301 = shalt.err (!%p298_p2)
}
   0x8   :  { %s302_s15 = scalar_lea.vmem %s15_s7, 32  ;;  %p307_p4 = scmp.lt.s32.totalorder %s15_s7, %s15_s7 }
   0x9   :  { %p303_p3 = scmp.ne.s32.totalorder %s15_s7, %s302_s15  ;;  %p308_p5 = scmp.lt.s32.totalorder %s302_s15, %s302_s15 }
   0xb   :  { %p309_p6 = por %p308_p5, %p307_p4 }
   0xd   :  { %p310_p7 = pnand %p309_p6, %p303_p3 }
   0xf   :  { %313 = shalt.err (!%p310_p7)
}
  0x10   :  { %17 = dma.hbm_to_vmem [thread:$0]  %s380_s0, 32, %s15_s7, [#allocation3]   ;;  %v21_v0 = vlaneseq }
  0x11   :  { %336 = dma.done.wait [#allocation3], 32  }
  0x12   :  { %337 = vsyncadd [#allocation3], 4294967264  ;;  %v341_v1 = vmov 0.0|0.0   ;;  %v22_v2 = vshrl.u32 %v21_v0, 7  ;;  %v39_v3 = vand.u32 127, %v21_v0  ;;  %vm342_vm0 = vmmov 0  }
  0x13   :  { %262 = vmatprep.subr.bf16.mxu0 %v341_v1  ;;  %v343_v4 = vmov 0.0   ;;  %v344_v10 = vmov 1.0|1.0   ;;  %v88_v21 = vld [vmem:[#allocation2] sm:$0x3]  ;;  %s345_s0 = smov [#allocation5]  }
  0x14   :  { %259 = vmatprep.mubr.msk.f32.mxu0 %vm342_vm0, %v343_v4  ;;  %v23_v5 = vadd.s32 8, %v22_v2  ;;  %vm40_vm1 = vcmp.le.s32.totalorder %v22_v2, %v39_v3  ;;  %v24_v6 = vadd.s32 16, %v22_v2  ;;  %v25_v7 = vadd.s32 24, %v22_v2  ;;  %s168_s18 = sshll.u32 %s345_s0, 4  ;;  %s169_s18 = int_to_ptr.vmem [resolvable:$true] %s168_s18 }
  0x15   :  { %v26_v8 = vadd.s32 32, %v22_v2  ;;  %v27_v9 = vadd.s32 40, %v22_v2  ;;  %v28_v11 = vadd.s32 48, %v22_v2  ;;  %v29_v12 = vadd.s32 56, %v22_v2  ;;  %s314_s19 = scalar_lea.vmem %s169_s18, 32  ;;  %p319_p9 = scmp.lt.s32.totalorder %s169_s18, %s169_s18 }
  0x16   :  { %vm41_vm2 = vcmp.le.s32.totalorder %v23_v5, %v39_v3  ;;  %vm42_vm3 = vcmp.le.s32.totalorder %v24_v6, %v39_v3  ;;  %vm43_vm4 = vcmp.le.s32.totalorder %v25_v7, %v39_v3  ;;  %v30_v13 = vadd.s32 64, %v22_v2  ;;  %p315_p8 = scmp.ne.s32.totalorder %s169_s18, %s314_s19  ;;  %p320_p10 = scmp.lt.s32.totalorder %s314_s19, %s314_s19 }
  0x17   :  { %vm263_vm5 = vmpackc.low %vm41_vm2, %vm40_vm1  ;;  %vm44_vm7 = vcmp.le.s32.totalorder %v26_v8, %v39_v3  ;;  %vm45_vm8 = vcmp.le.s32.totalorder %v27_v9, %v39_v3  ;;  %vm46_vm10 = vcmp.le.s32.totalorder %v28_v11, %v39_v3  ;;  %vm47_vm11 = vcmp.le.s32.totalorder %v29_v12, %v39_v3 }
  0x18   :  { %264 = vmatpush3.bf16.msk.msra.mxu0 %vm263_vm5, %v344_v10  ;;  %vm266_vm6 = vmpackc.low %vm43_vm4, %vm42_vm3  ;;  %v31_v14 = vadd.s32 72, %v22_v2  ;;  %vm48_vm13 = vcmp.le.s32.totalorder %v30_v13, %v39_v3  ;;  %v32_v15 = vadd.s32 80, %v22_v2  ;;  %v33_v16 = vadd.s32 88, %v22_v2  ;;  %p321_p11 = por %p320_p10, %p319_p9 }
  0x19   :  { %265 = vmatprep.subr.bf16.mxu0 %v341_v1  ;;  %vm269_vm9 = vmpackc.low %vm45_vm8, %vm44_vm7  ;;  %v34_v17 = vadd.s32 96, %v22_v2  ;;  %v35_v18 = vadd.s32 104, %v22_v2  ;;  %v36_v19 = vadd.s32 112, %v22_v2  ;;  %v37_v20 = vadd.s32 120, %v22_v2 }
  0x1a   :  { %vm272_vm12 = vmpackc.low %vm47_vm11, %vm46_vm10  ;;  %vm49_vm14 = vcmp.le.s32.totalorder %v31_v14, %v39_v3  ;;  %vm50_vm0 = vcmp.le.s32.totalorder %v32_v15, %v39_v3  ;;  %vm51_vm1 = vcmp.le.s32.totalorder %v33_v16, %v39_v3  ;;  %p322_p12 = pnand %p321_p11, %p315_p8 }
  0x1b   :  { %vm275_vm15 = vmpackc.low %vm49_vm14, %vm48_vm13  ;;  %vm52_vm3 = vcmp.le.s32.totalorder %v34_v17, %v39_v3  ;;  %vm53_vm4 = vcmp.le.s32.totalorder %v35_v18, %v39_v3  ;;  %vm55_vm7 = vcmp.le.s32.totalorder %v37_v20, %v39_v3 }
  0x1c   :  { %267 = vmatpush3.bf16.msk.msra.mxu0 %vm266_vm6, %v344_v10  ;;  %vm278_vm2 = vmpackc.low %vm51_vm1, %vm50_vm0  ;;  %vm54_vm6 = vcmp.le.s32.totalorder %v36_v19, %v39_v3 }
  0x1d   :  { %268 = vmatprep.subr.bf16.mxu0 %v341_v1  ;;  %vm281_vm5 = vmpackc.low %vm53_vm4, %vm52_vm3 }
  0x1e   :  { %vm284_vm8 = vmpackc.low %vm55_vm7, %vm54_vm6 }
  0x20   :  { %270 = vmatpush3.bf16.msk.msra.mxu0 %vm269_vm9, %v344_v10 }
  0x21   :  { %271 = vmatprep.subr.bf16.mxu0 %v341_v1 }
  0x24   :  { %273 = vmatpush3.bf16.msk.msra.mxu0 %vm272_vm12, %v344_v10 }
  0x25   :  { %274 = vmatprep.subr.bf16.mxu0 %v341_v1 }
  0x28   :  { %276 = vmatpush3.bf16.msk.msra.mxu0 %vm275_vm15, %v344_v10 }
  0x29   :  { %277 = vmatprep.subr.bf16.mxu0 %v341_v1 }
  0x2c   :  { %279 = vmatpush3.bf16.msk.msra.mxu0 %vm278_vm2, %v344_v10 }
  0x2d   :  { %280 = vmatprep.subr.bf16.mxu0 %v341_v1 }
  0x30   :  { %282 = vmatpush3.bf16.msk.msra.mxu0 %vm281_vm5, %v344_v10 }
  0x31   :  { %283 = vmatprep.subr.bf16.mxu0 %v341_v1 }
  0x34   :  { %285 = vmatpush3.bf16.msk.msra.mxu0 %vm284_vm8, %v344_v10 }
  0x37   :  { %260 = vmatmul.mubr.f32.vlgmr.msra.gmra.mrb[0].mxu0 %v88_v21 }
 0x10a   :  { %v155_v22 = vpop.f32.mrb[0].mxu0 }
 0x10b   :  { %v209_v23 = vadd.f32 -1.0, %v155_v22  ;;  %v261_v24 = vpop.f32.mrb[1].mxu0 }
 0x10d   :  { %v160_v25 = vmul.f32 %v209_v23, %v88_v21 }
 0x10f   :  { %161 = vst [vmem:[#allocation5] sm:$0x3] %v160_v25 }
 0x110   :  { %325 = shalt.err (!%p322_p12)
}
 0x111   :  { %s326_s22 = scalar_lea.hbm %s381_s1, 32 }
 0x112   :  { %p327_p13 = scmp.ne.s32.totalorder %s381_s1, %s326_s22  ;;  %p330_p0 = scmp.lt.u32.totalorder %s326_s22, %s381_s1 }
 0x114   :  { %p332_p1 = pnand %p330_p0, %p327_p13 }
 0x116   :  { %335 = shalt.err (!%p332_p1)
}
 0x117   :  { %171 = dma.vmem_to_hbm [thread:$0]  %s169_s18, 32, %s381_s1, [#allocation4]  }
 0x118   :  { %338 = dma.done.wait [#allocation4], 32  }
 0x119   :  { %339 = vsyncadd [#allocation4], 4294967264 }
 0x11a   :  { %175 = vsyncpa [#allocation3], 1 }
 0x11b   :  { %176 = vsyncpa [#allocation4], 1 }

</bundles_post_ra>
